<compile_context>
chip_gen: v7x
topology: tpu7x:2x2x1
jax: 0.10.0
libtpu: 0.0.40
codegen_flags: <defaults>
</compile_context>

<pallas_src>
import jax
import jax.numpy as jnp
from jax.experimental import pallas as pl
from jax.experimental.pallas import tpu as pltpu


_LANE = 128
_MiB = 1024 * 1024


def _round_up(v: int, m: int) -> int:
    return ((v + m - 1) // m) * m


def _pick_width(n: int):
    """Widest lane-dense last dim that divides n exactly (no pad copy)."""
    for w in (4096, 2048, 1024, 512, 256, _LANE):
        if n % w == 0:
            return w
    return None


def _tpu_vmem_and_cores():
    """Best-effort trace-time hardware query; safe fallbacks if unavailable."""
    vmem_bytes = None
    num_cores = 1
    try:
        info = pltpu.get_tpu_info()
        v = getattr(info, "vmem_capacity_bytes", None)
        if isinstance(v, int) and v > 0:
            vmem_bytes = v
        for name in ("num_tensorcores", "tensorcore_count", "num_cores", "core_count"):
            c = getattr(info, name, None)
            if isinstance(c, int) and c > 0:
                num_cores = c
                break
    except Exception:
        pass
    return vmem_bytes, num_cores


def _leaky_relu_kernel(slope_ref, x_ref, o_ref):
    x = x_ref[...]
    slope = slope_ref[0].astype(x.dtype)
    zero = jnp.zeros_like(x)
    # Exactly mirrors the PyTorch module: maximum(x, 0) + slope * minimum(x, 0)
    o_ref[...] = jnp.maximum(x, zero) + slope * jnp.minimum(x, zero)


def _leaky_relu_2d(x2d: jax.Array, slope_arr: jax.Array) -> jax.Array:
    """Run the Pallas kernel on a lane-dense (rows, width) view."""
    rows, width = x2d.shape
    dtype = x2d.dtype
    itemsize = jnp.dtype(dtype).itemsize
    # Row quantum keeping block shapes legal for f32/bf16/int8 packing.
    sub_quant = max(8, 32 // itemsize)

    vmem_bytes, num_cores = _tpu_vmem_and_cores()
    if vmem_bytes is not None and vmem_bytes >= 96 * _MiB:
        target_block_bytes = 8 * _MiB   # v5e / v6e: 128 MiB VMEM, bigger tiles are free
    else:
        target_block_bytes = 4 * _MiB   # v7x (64 MiB physical) or unknown: stay modest

    if rows <= sub_quant:
        # Tiny input: one block equal to the full extent (always legal).
        block_rows = rows
    else:
        target_rows = max(
            sub_quant,
            (target_block_bytes // (width * itemsize)) // sub_quant * sub_quant,
        )
        if num_cores <= 1 or rows <= 2 * sub_quant:
            # Single TensorCore: grid is a serial loop, so never force extra steps.
            block_rows = min(target_rows, rows)
        else:
            # Multi-TC (v7x megacore): even number of near-equal blocks so the
            # "parallel" grid axis splits cleanly across both TensorCores.
            steps = pl.cdiv(rows, target_rows)
            steps = max(2, 2 * ((steps + 1) // 2))          # round up to even
            block_rows = min(_round_up(pl.cdiv(rows, steps), sub_quant), rows)

    grid = (pl.cdiv(rows, block_rows),)

    block_bytes = block_rows * width * itemsize
    # ~2 buffers x 2 arrays x block + slack for Mosaic internal scratch.
    vmem_limit = max(32 * _MiB, 4 * block_bytes + 16 * _MiB)
    if vmem_bytes is not None:
        vmem_limit = min(vmem_limit, max(32 * _MiB, vmem_bytes - 16 * _MiB))

    n_elems = rows * width
    cost = pl.CostEstimate(
        flops=4 * n_elems,
        transcendentals=0,
        bytes_accessed=2 * n_elems * itemsize,
    )

    return pl.pallas_call(
        _leaky_relu_kernel,
        out_shape=jax.ShapeDtypeStruct((rows, width), dtype),
        grid_spec=pltpu.PrefetchScalarGridSpec(
            num_scalar_prefetch=0,
            grid=grid,
            in_specs=[
                pl.BlockSpec(memory_space=pltpu.MemorySpace.SMEM),   # slope scalar
                pl.BlockSpec((block_rows, width), lambda i: (i, 0)),
            ],
            out_specs=pl.BlockSpec((block_rows, width), lambda i: (i, 0)),
        ),
        compiler_params=pltpu.CompilerParams(
            dimension_semantics=("parallel",),
            vmem_limit_bytes=int(vmem_limit),
        ),
        cost_estimate=cost,
    )(slope_arr, x2d)


def leaky_relu(x: jax.Array, negative_slope: float = 0.01) -> jax.Array:
    """LeakyReLU forward, matching the PyTorch module semantics."""
    orig_shape = x.shape
    dtype = x.dtype
    n = x.size
    if n == 0:
        return x

    # Runtime SMEM scalar -> no recompile per distinct slope value.
    slope_arr = jnp.full((1,), negative_slope, dtype=jnp.float32)

    if n % _LANE == 0:
        width = _pick_width(n)
        rows = n // width
        out2d = _leaky_relu_2d(jnp.reshape(x, (rows, width)), slope_arr)
        return jnp.reshape(out2d, orig_shape)

    # ---- odd-size fallback: kernel on the 128-aligned prefix, tiny tail in jnp ----
    x_flat = jnp.reshape(x, (-1,))
    main_n = (n // _LANE) * _LANE
    tail = x_flat[main_n:]
    zero_t = jnp.zeros_like(tail)
    slope_t = jnp.asarray(negative_slope, dtype=dtype)
    tail_out = jnp.maximum(tail, zero_t) + slope_t * jnp.minimum(tail, zero_t)
    if main_n == 0:
        return jnp.reshape(tail_out, orig_shape)
    width = _pick_width(main_n)
    main2d = jnp.reshape(x_flat[:main_n], (main_n // width, width))
    main_out = jnp.reshape(_leaky_relu_2d(main2d, slope_arr), (-1,))
    return jnp.reshape(jnp.concatenate([main_out, tail_out]), orig_shape)


if __name__ == "__main__":
    key = jax.random.PRNGKey(0)

    # Small NCHW input consistent with the GAN/VAE module: batch=2, ch=4, 16x16.
    x = jax.random.normal(key, (2, 4, 16, 16), dtype=jnp.float32)
    y = leaky_relu(x, negative_slope=0.01)
    jax.block_until_ready(y)
    ref = jnp.maximum(x, 0.0) + 0.01 * jnp.minimum(x, 0.0)
    assert y.shape == x.shape and y.dtype == x.dtype
    assert jnp.allclose(y, ref, atol=1e-6), "mismatch vs reference"

    # Odd-size input, n < 128: pure-jnp tail path.
    x2 = jax.random.normal(jax.random.PRNGKey(1), (3, 5, 7), dtype=jnp.float32)
    y2 = leaky_relu(x2, negative_slope=0.2)
    jax.block_until_ready(y2)
    ref2 = jnp.maximum(x2, 0.0) + 0.2 * jnp.minimum(x2, 0.0)
    assert jnp.allclose(y2, ref2, atol=1e-6), "mismatch vs reference (tiny fallback)"

    # Odd-size input, n > 128: kernel on aligned prefix + jnp tail.
    x3 = jax.random.normal(jax.random.PRNGKey(2), (3, 67), dtype=jnp.float32)
    y3 = leaky_relu(x3, negative_slope=0.1)
    jax.block_until_ready(y3)
    ref3 = jnp.maximum(x3, 0.0) + 0.1 * jnp.minimum(x3, 0.0)
    assert jnp.allclose(y3, ref3, atol=1e-6), "mismatch vs reference (prefix fallback)"

    # Larger input (~12 MiB f32) to exercise the multi-block / ragged-tail path.
    x4 = jax.random.normal(jax.random.PRNGKey(3), (24, 4, 128, 256), dtype=jnp.float32)
    y4 = leaky_relu(x4, negative_slope=0.01)
    jax.block_until_ready(y4)
    ref4 = jnp.maximum(x4, 0.0) + 0.01 * jnp.minimum(x4, 0.0)
    assert jnp.allclose(y4, ref4, atol=1e-6), "mismatch vs reference (multi-block)"

    print("KERNEL_OK")
</pallas_src>

<mosaic_0001>
module attributes {stable_mosaic.version = 11 : i64} {
  func.func @_leaky_relu_kernel(%arg0: i32, %arg1: memref<1xf32, #tpu.memory_space<smem>>, %arg2: memref<1x2048xf32, #tpu.memory_space<vmem>>, %arg3: memref<1x2048xf32, #tpu.memory_space<vmem>>) attributes {dimension_semantics = [#tpu.dimension_semantics<parallel>], iteration_bounds = array<i64: 1>, scalar_prefetch = 0 : i64, scratch_operands = 0 : i64, tpu.core_type = #tpu.core_type<tc>, window_params = [{transform_indices = @transform_0, window_bounds = array<i64: 1>}, {transform_indices = @transform_1, window_bounds = array<i64: 1, 2048>}, {transform_indices = @transform_2, window_bounds = array<i64: 1, 2048>}]} {
    %c0 = arith.constant 0 : index
    %c0_0 = arith.constant 0 : index
    %0 = vector.load %arg2[%c0, %c0_0] : memref<1x2048xf32, #tpu.memory_space<vmem>>, vector<1x2048xf32>
    %c0_1 = arith.constant 0 : index
    %1 = memref.load %arg1[%c0_1] : memref<1xf32, #tpu.memory_space<smem>>
    %cst = arith.constant 0.000000e+00 : f32
    %2 = vector.broadcast %cst : f32 to vector<1x2048xf32>
    %3 = arith.maximumf %0, %2 : vector<1x2048xf32>
    %4 = arith.minimumf %0, %2 : vector<1x2048xf32>
    %5 = vector.broadcast %1 : f32 to vector<1x2048xf32>
    %6 = arith.mulf %5, %4 : vector<1x2048xf32>
    %7 = arith.addf %3, %6 : vector<1x2048xf32>
    %c0_2 = arith.constant 0 : index
    %c0_3 = arith.constant 0 : index
    %8 = vector.load %arg3[%c0_2, %c0_3] : memref<1x2048xf32, #tpu.memory_space<vmem>>, vector<1x2048xf32>
    tpu.vector_store %arg3[%c0_2, %c0_3], %7 {strides = array<i32>} : memref<1x2048xf32, #tpu.memory_space<vmem>>, vector<1x2048xf32>,
    return
  }
  func.func @transform_0(%arg0: i32) -> i32 {
    %c0_i32 = arith.constant 0 : i32
    %c0_i32_0 = arith.constant 0 : i32
    return %c0_i32 : i32
  }
  func.func @transform_1(%arg0: i32) -> (i32, i32) {
    %c0_i32 = arith.constant 0 : i32
    %c0_i32_0 = arith.constant 0 : i32
    return %arg0, %c0_i32 : i32, i32
  }
  func.func @transform_2(%arg0: i32) -> (i32, i32) {
    %c0_i32 = arith.constant 0 : i32
    %c0_i32_0 = arith.constant 0 : i32
    return %arg0, %c0_i32 : i32, i32
  }
}

</mosaic_0001>

<bundles_post_ra>
// kernel: tpu_custom_call.1
= control target key start
LH: loop header
LB: loop body
LE: loop exit
PB: predicated region body
PF: predicated region fallthrough
CT: control target
= control target key end

     0   :  { %8 = vsyncpa [#allocation4], 0  ;;  %s148_s0 = inlined_call_operand.<no memory space> [shape: f32[1], index: 0, kind: input, shape index: {}]   ;;  %s149_s1 = inlined_call_operand.hbm [shape: f32[1,2048], index: 1, kind: input, shape index: {}]   ;;  %s150_s2 = inlined_call_operand.hbm [shape: f32[1,2048], index: 2, kind: output, shape index: {}]  }
   0x1   :  { %9 = vsyncpa [#allocation5], 0  ;;  %s104_s9 = smov [#allocation3]   ;;  %s56_s13 = scalar_lea.hbm %s149_s1, 256 }
   0x2   :  { %s18_s10 = sshll.u32 %s104_s9, 4  ;;  %p57_p0 = scmp.ne.s32.totalorder %s149_s1, %s56_s13  ;;  %s19_s10 = int_to_ptr.vmem [resolvable:$true] %s18_s10 }
   0x3   :  { %p60_p1 = scmp.lt.u32.totalorder %s56_s13, %s149_s1 }
   0x5   :  { %p62_p2 = pnand %p60_p1, %p57_p0 }
   0x7   :  { %65 = shalt.err (!%p62_p2)
}
   0x8   :  { %s66_s18 = scalar_lea.vmem %s19_s10, 256  ;;  %p71_p4 = scmp.lt.s32.totalorder %s19_s10, %s19_s10 }
   0x9   :  { %p67_p3 = scmp.ne.s32.totalorder %s19_s10, %s66_s18  ;;  %p72_p5 = scmp.lt.s32.totalorder %s66_s18, %s66_s18 }
   0xb   :  { %p73_p6 = por %p72_p5, %p71_p4 }
   0xd   :  { %p74_p7 = pnand %p73_p6, %p67_p3 }
   0xf   :  { %77 = shalt.err (!%p74_p7)
}
  0x10   :  { %21 = dma.hbm_to_vmem [thread:$0]  %s149_s1, 256, %s19_s10, [#allocation4]  }
  0x11   :  { %100 = dma.done.wait [#allocation4], 256  }
  0x12   :  { %101 = vsyncadd [#allocation4], 4294967040  ;;  %v25_v0 = vld [vmem:[#allocation3] sm:$0xff]  ;;  %v32_v1 = vstv %s148_s0  ;;  %v26_v2 = vld [vmem:[#allocation3 + $0x8] sm:$0xff]  ;;  %s105_s23 = smov [#allocation6]  }
  0x13   :  { %v28_v3 = vmax.f32 %v25_v0, 0.0  ;;  %v30_v4 = vmin.f32 %v25_v0, 0.0  ;;  %v29_v5 = vmax.f32 %v26_v2, 0.0  ;;  %v31_v6 = vmin.f32 %v26_v2, 0.0  ;;  %s45_s24 = sshll.u32 %s105_s23, 4  ;;  %s46_s24 = int_to_ptr.vmem [resolvable:$true] %s45_s24 }
  0x14   :  { %s78_s1 = scalar_lea.vmem %s46_s24, 256  ;;  %p83_p9 = scmp.lt.s32.totalorder %s46_s24, %s46_s24 }
  0x15   :  { %v33_v7 = vmul.f32 %v32_v1, %v30_v4  ;;  %v34_v8 = vmul.f32 %v32_v1, %v31_v6  ;;  %p79_p8 = scmp.ne.s32.totalorder %s46_s24, %s78_s1  ;;  %p84_p10 = scmp.lt.s32.totalorder %s78_s1, %s78_s1 }
  0x17   :  { %v35_v9 = vadd.f32 %v33_v7, %v28_v3  ;;  %v36_v10 = vadd.f32 %v34_v8, %v29_v5  ;;  %p85_p11 = por %p84_p10, %p83_p9 }
  0x19   :  { %37 = vst [vmem:[#allocation6] sm:$0xff] %v35_v9  ;;  %38 = vst [vmem:[#allocation6 + $0x8] sm:$0xff] %v36_v10  ;;  %p86_p12 = pnand %p85_p11, %p79_p8 }
  0x1b   :  { %89 = shalt.err (!%p86_p12)
}
  0x1c   :  { %s90_s26 = scalar_lea.hbm %s150_s2, 256 }
  0x1d   :  { %p91_p13 = scmp.ne.s32.totalorder %s150_s2, %s90_s26  ;;  %p94_p0 = scmp.lt.u32.totalorder %s90_s26, %s150_s2 }
  0x1f   :  { %p96_p1 = pnand %p94_p0, %p91_p13 }
  0x21   :  { %99 = shalt.err (!%p96_p1)
}
  0x22   :  { %48 = dma.vmem_to_hbm [thread:$0]  %s46_s24, 256, %s150_s2, [#allocation5]  }
  0x23   :  { %102 = dma.done.wait [#allocation5], 256  }
  0x24   :  { %103 = vsyncadd [#allocation5], 4294967040 }
  0x25   :  { %52 = vsyncpa [#allocation4], 1 }
  0x26   :  { %53 = vsyncpa [#allocation5], 1 }

</bundles_post_ra>
